<compile_context>
chip_gen: v6e
topology: v6e:2x2x1
jax: 0.10.0
libtpu: 0.0.40
codegen_flags: <defaults>
</compile_context>

<pallas_src>
import functools
import math

import jax
import jax.numpy as jnp
from jax.experimental import pallas as pl
from jax.experimental.pallas import tpu as pltpu


# ----------------------------- Pallas kernel --------------------------------
def qval_kernel(s_ref, a_ref, w1s_ref, w1a_ref, b1_ref, w2_ref, b2_ref,
                w3_ref, b3_ref, wq_ref, bq_ref, q_ref, *,
                compute_dtype, action_dim, use_rank_update):
    """Fused 4-layer MLP on one batch tile.

    fc1 is split:  h1 = state @ w1_s + action-part + b1  (== concat @ w1 + b1)
    Weights arrive already in `compute_dtype`; accumulation is f32 via
    preferred_element_type; bias adds / relu stay f32.
    """
    cd = compute_dtype
    s = s_ref[...].astype(cd)

    # fc1: state part on the MXU; tiny-K action part as VPU rank-1 updates.
    h = jnp.dot(s, w1s_ref[...], preferred_element_type=jnp.float32) + b1_ref[...]
    if use_rank_update:
        a = a_ref[...].astype(jnp.float32)
        for k in range(action_dim):                      # static unroll (A == 2)
            h = h + a[:, k:k + 1] * w1a_ref[k:k + 1, :]
    else:
        h = h + jnp.dot(a_ref[...].astype(cd), w1a_ref[...],
                        preferred_element_type=jnp.float32)
    h = jnp.maximum(h, 0.0)

    h = jnp.dot(h.astype(cd), w2_ref[...],
                preferred_element_type=jnp.float32) + b2_ref[...]
    h = jnp.maximum(h, 0.0)

    h = jnp.dot(h.astype(cd), w3_ref[...],
                preferred_element_type=jnp.float32) + b3_ref[...]
    h = jnp.maximum(h, 0.0)

    q_ref[...] = (jnp.dot(h.astype(cd), wq_ref[...],
                          preferred_element_type=jnp.float32)
                  + bq_ref[...]).astype(q_ref.dtype)      # (tile_b, n_action)


# ------------------------------- wrapper -------------------------------------
def _round_up(x, m):
    return ((x + m - 1) // m) * m


def _default_tile_cap():
    """Per-generation batch-tile cap: conservative on v5e (16 MiB scoped
    default), larger elsewhere (v6e/v7x comfortably fit bigger tiles)."""
    try:
        kind = jax.devices()[0].device_kind.lower()
    except Exception:
        return 4096
    if "v5" in kind:
        return 4096
    return 8192


def qval_forward(extract_state, action, params, *, tile_b=None,
                 compute_dtype=jnp.float32, xla_fallback_max_batch=0):
    """mode == 'batch': features along dim=1. Batch-tiled fused MLP kernel."""
    w1, b1, w2, b2, w3, b3, wq, bq = params
    B, F = extract_state.shape
    A = action.shape[1]
    H = w1.shape[1]
    n_action = wq.shape[1]

    # Tiny online batches: launch + DMA-descriptor overhead dominates; allow a
    # plain-XLA path (disabled by default so the Pallas kernel is exercised).
    if B <= xla_fallback_max_batch:
        return qval_reference(extract_state, action, params)

    # Split fc1's weight so no (B, F+A) concat is ever materialized in HBM.
    w1s, w1a = w1[:F], w1[F:]

    cd = jnp.dtype(compute_dtype)
    use_rank_update = A <= 8
    # Pre-cast MXU weight operands once (they stay VMEM-resident across tiles).
    w1s = w1s.astype(cd)
    w2c = w2.astype(cd)
    w3c = w3.astype(cd)
    wqc = wq.astype(cd)
    if not use_rank_update:
        w1a = w1a.astype(cd)           # only needed if the matmul path is used

    # Batch tiling: B <= cap -> single step, block == full batch dim (no pad,
    # no ragged block).  B > cap -> multiple-of-8 tiles, ragged last block
    # handled by Pallas (row-independent ops, masked partial output store).
    cap = max(8, int(tile_b) if tile_b is not None else _default_tile_cap())
    if B <= cap:
        tile_b = B
    else:
        tile_b = _round_up(min(cap, B), 8)
    grid = (pl.cdiv(B, tile_b),)

    def tiled(cols):                   # batch-tiled arrays (x in, q out)
        return pl.BlockSpec((tile_b, cols), lambda i: (i, 0))

    def resident(arr):                 # weights/biases: one DMA, stay in VMEM
        return pl.BlockSpec(arr.shape, lambda i: (0, 0))

    in_specs = [
        tiled(F),                      # extract_state
        tiled(A),                      # action
        resident(w1s), resident(w1a), resident(b1),
        resident(w2c), resident(b2),
        resident(w3c), resident(b3),
        resident(wqc), resident(bq),
    ]
    out_specs = tiled(n_action)

    # VMEM budget: double-buffered x/q tiles + resident params + f32
    # intermediates (incl. fc1 partial products) + compute-dtype activation /
    # input copies, with 2x headroom.  Capped below v7x's 64 MiB physical VMEM.
    param_bytes = sum(int(p.size) * p.dtype.itemsize
                      for p in (w1s, w1a, b1, w2c, b2, w3c, b3, wqc, bq))
    io_bytes = 2 * tile_b * (F * extract_state.dtype.itemsize
                             + A * action.dtype.itemsize
                             + n_action * 4)             # double-buffered in/out
    act_bytes = (6 * tile_b * H * 4                       # f32 intermediates
                 + 2 * tile_b * H * cd.itemsize           # compute-dtype copies
                 + tile_b * (F + A) * cd.itemsize)        # input casts
    vmem_limit = int(min(48 * 1024 * 1024,
                         max(8 * 1024 * 1024,
                             2 * (param_bytes + io_bytes + act_bytes))))

    kernel = functools.partial(qval_kernel, compute_dtype=cd, action_dim=A,
                               use_rank_update=use_rank_update)

    return pl.pallas_call(
        kernel,
        out_shape=jax.ShapeDtypeStruct((B, n_action), jnp.float32),
        grid=grid,
        in_specs=in_specs,
        out_specs=out_specs,
        compiler_params=pltpu.CompilerParams(
            dimension_semantics=("parallel",),   # megacore sharding on v7x
            vmem_limit_bytes=vmem_limit,
        ),
    )(extract_state, action, w1s, w1a, b1, w2c, b2, w3c, b3, wqc, bq)


# --------------------------- parameter construction --------------------------
def init_linear(key, in_features, out_features):
    """PyTorch-style init U(-1/sqrt(in), 1/sqrt(in)).

    Weight is stored transposed (in_features, out_features) so the kernel does
    x @ W; bias is (1, out_features) for 2-D broadcasting in the kernel.
    """
    kw, kb = jax.random.split(key)
    bound = 1.0 / math.sqrt(in_features)
    w = jax.random.uniform(kw, (in_features, out_features), jnp.float32,
                           minval=-bound, maxval=bound)
    b = jax.random.uniform(kb, (1, out_features), jnp.float32,
                           minval=-bound, maxval=bound)
    return w, b


def make_params(key, feature_extractor, n_action):
    last_hidden = feature_extractor * 2
    k1, k2, k3, k4 = jax.random.split(key, 4)
    w1, b1 = init_linear(k1, feature_extractor + n_action, last_hidden)
    w2, b2 = init_linear(k2, last_hidden, last_hidden)
    w3, b3 = init_linear(k3, last_hidden, last_hidden)
    wq, bq = init_linear(k4, last_hidden, n_action)
    return (w1, b1, w2, b2, w3, b3, wq, bq)


# ------------------------------ reference (JAX) ------------------------------
def qval_reference(extract_state, action, params):
    x = jnp.concatenate([extract_state, action], axis=1)   # torch.cat(dim=1)
    w1, b1, w2, b2, w3, b3, wq, bq = params
    h = jax.nn.relu(x @ w1 + b1)
    h = jax.nn.relu(h @ w2 + b2)
    h = jax.nn.relu(h @ w3 + b3)
    return h @ wq + bq


# ---------------------------------- main -------------------------------------
if __name__ == "__main__":
    # Args implied by the module: n_hidden=32, n_rnn_layers=1, rnn_directions=1,
    # use_handcraft=0  ->  feature_extractor = 32, last_hidden = 64.
    n_hidden = 32
    n_rnn_layers = 1
    rnn_directions = 1
    n_handcrafted_features = 0
    use_handcraft = 0
    n_action = 2
    feature_extractor = (n_hidden * n_rnn_layers * rnn_directions
                         + n_handcrafted_features * use_handcraft)

    key = jax.random.PRNGKey(0)
    k_state, k_action, k_params = jax.random.split(key, 3)
    params = make_params(k_params, feature_extractor, n_action)

    # 1) Small batch (B=2) — matches the module's typical online usage.
    batch = 2
    extract_state = jax.random.normal(k_state, (batch, feature_extractor),
                                      jnp.float32)
    action = jax.random.normal(k_action, (batch, n_action), jnp.float32)

    qval = jax.block_until_ready(qval_forward(extract_state, action, params))
    ref = qval_reference(extract_state, action, params)
    assert qval.shape == (batch, n_action)
    assert jnp.allclose(qval, ref, atol=1e-4, rtol=1e-4), "mismatch vs reference (B=2)"

    # 2) Larger batch, default tiling (single grid step, block == full batch).
    big_b = 1024
    ks2, ka2 = jax.random.split(jax.random.PRNGKey(1))
    big_state = jax.random.normal(ks2, (big_b, feature_extractor), jnp.float32)
    big_action = jax.random.normal(ka2, (big_b, n_action), jnp.float32)

    q_big = jax.block_until_ready(qval_forward(big_state, big_action, params))
    ref_big = qval_reference(big_state, big_action, params)
    assert q_big.shape == (big_b, n_action)
    assert jnp.allclose(q_big, ref_big, atol=1e-4, rtol=1e-4), \
        "mismatch vs reference (B=1024)"

    # 3) Ragged multi-tile path: B not a multiple of tile_b (no wrapper pad).
    rag_b = 1000
    ks3, ka3 = jax.random.split(jax.random.PRNGKey(2))
    rag_state = jax.random.normal(ks3, (rag_b, feature_extractor), jnp.float32)
    rag_action = jax.random.normal(ka3, (rag_b, n_action), jnp.float32)
    q_rag = jax.block_until_ready(
        qval_forward(rag_state, rag_action, params, tile_b=256))   # grid=4, last block partial
    ref_rag = qval_reference(rag_state, rag_action, params)
    assert q_rag.shape == (rag_b, n_action)
    assert jnp.allclose(q_rag, ref_rag, atol=1e-4, rtol=1e-4), \
        "mismatch vs reference (B=1000, ragged last tile)"

    # 4) bf16 matmul-operand path (MXU-native on v6e/v7x), f32 accumulation.
    q_bf16 = jax.block_until_ready(
        qval_forward(big_state, big_action, params, compute_dtype=jnp.bfloat16))
    assert q_bf16.shape == (big_b, n_action)
    assert jnp.allclose(q_bf16, ref_big, atol=1e-1, rtol=1e-1), \
        "bf16 path diverged beyond bf16 tolerance"

    print("KERNEL_OK")
</pallas_src>

<mosaic_0001>
module attributes {stable_mosaic.version = 11 : i64} {
  func.func @qval_kernel(%arg0: i32, %arg1: memref<2x32xf32, #tpu.memory_space<vmem>>, %arg2: memref<2x2xf32, #tpu.memory_space<vmem>>, %arg3: memref<32x64xf32, #tpu.memory_space<vmem>>, %arg4: memref<2x64xf32, #tpu.memory_space<vmem>>, %arg5: memref<1x64xf32, #tpu.memory_space<vmem>>, %arg6: memref<64x64xf32, #tpu.memory_space<vmem>>, %arg7: memref<1x64xf32, #tpu.memory_space<vmem>>, %arg8: memref<64x64xf32, #tpu.memory_space<vmem>>, %arg9: memref<1x64xf32, #tpu.memory_space<vmem>>, %arg10: memref<64x2xf32, #tpu.memory_space<vmem>>, %arg11: memref<1x2xf32, #tpu.memory_space<vmem>>, %arg12: memref<2x2xf32, #tpu.memory_space<vmem>>) attributes {dimension_semantics = [#tpu.dimension_semantics<parallel>], iteration_bounds = array<i64: 1>, scalar_prefetch = 0 : i64, scratch_operands = 0 : i64, tpu.core_type = #tpu.core_type<tc>, window_params = [{transform_indices = @transform_0, window_bounds = array<i64: 2, 32>}, {transform_indices = @transform_1, window_bounds = array<i64: 2, 2>}, {pipeline_mode = #tpu.pipeline_mode<synchronous>, transform_indices = @transform_2, window_bounds = array<i64: 32, 64>}, {pipeline_mode = #tpu.pipeline_mode<synchronous>, transform_indices = @transform_3, window_bounds = array<i64: 2, 64>}, {pipeline_mode = #tpu.pipeline_mode<synchronous>, transform_indices = @transform_4, window_bounds = array<i64: 1, 64>}, {pipeline_mode = #tpu.pipeline_mode<synchronous>, transform_indices = @transform_5, window_bounds = array<i64: 64, 64>}, {pipeline_mode = #tpu.pipeline_mode<synchronous>, transform_indices = @transform_6, window_bounds = array<i64: 1, 64>}, {pipeline_mode = #tpu.pipeline_mode<synchronous>, transform_indices = @transform_7, window_bounds = array<i64: 64, 64>}, {pipeline_mode = #tpu.pipeline_mode<synchronous>, transform_indices = @transform_8, window_bounds = array<i64: 1, 64>}, {pipeline_mode = #tpu.pipeline_mode<synchronous>, transform_indices = @transform_9, window_bounds = array<i64: 64, 2>}, {pipeline_mode = #tpu.pipeline_mode<synchronous>, transform_indices = @transform_10, window_bounds = array<i64: 1, 2>}, {transform_indices = @transform_11, window_bounds = array<i64: 2, 2>}]} {
    %c0 = arith.constant 0 : index
    %c0_0 = arith.constant 0 : index
    %0 = vector.load %arg1[%c0, %c0_0] : memref<2x32xf32, #tpu.memory_space<vmem>>, vector<2x32xf32>
    %c0_1 = arith.constant 0 : index
    %c0_2 = arith.constant 0 : index
    %1 = vector.load %arg3[%c0_1, %c0_2] : memref<32x64xf32, #tpu.memory_space<vmem>>, vector<32x64xf32>
    %cst = arith.constant dense<0.000000e+00> : vector<2x64xf32>
    %2 = tpu.matmul %0, %1, %cst {dimension_numbers = #tpu.dot_dimension_numbers<[1], [0], [0], [1], [0, 0, 1, 1], [], []>} : vector<2x32xf32>, vector<32x64xf32>, vector<2x64xf32> -> vector<2x64xf32>
    %c0_3 = arith.constant 0 : index
    %c0_4 = arith.constant 0 : index
    %3 = vector.load %arg5[%c0_3, %c0_4] : memref<1x64xf32, #tpu.memory_space<vmem>>, vector<1x64xf32>
    %4 = vector.broadcast %3 : vector<1x64xf32> to vector<2x64xf32>
    %5 = arith.addf %2, %4 : vector<2x64xf32>
    %c0_5 = arith.constant 0 : index
    %c0_6 = arith.constant 0 : index
    %6 = vector.load %arg2[%c0_5, %c0_6] : memref<2x2xf32, #tpu.memory_space<vmem>>, vector<2x2xf32>
    %7 = vector.extract_strided_slice %6 {offsets = [0, 0], sizes = [2, 1], strides = [1, 1]} : vector<2x2xf32> to vector<2x1xf32>
    %c0_7 = arith.constant 0 : index
    %c0_8 = arith.constant 0 : index
    %8 = vector.load %arg4[%c0_7, %c0_8] : memref<2x64xf32, #tpu.memory_space<vmem>>, vector<1x64xf32>
    %9 = vector.broadcast %7 : vector<2x1xf32> to vector<2x64xf32>
    %10 = vector.broadcast %8 : vector<1x64xf32> to vector<2x64xf32>
    %11 = arith.mulf %9, %10 : vector<2x64xf32>
    %12 = arith.addf %5, %11 : vector<2x64xf32>
    %13 = vector.extract_strided_slice %6 {offsets = [0, 1], sizes = [2, 1], strides = [1, 1]} : vector<2x2xf32> to vector<2x1xf32>
    %c1 = arith.constant 1 : index
    %c0_9 = arith.constant 0 : index
    %14 = vector.load %arg4[%c1, %c0_9] : memref<2x64xf32, #tpu.memory_space<vmem>>, vector<1x64xf32>
    %15 = vector.broadcast %13 : vector<2x1xf32> to vector<2x64xf32>
    %16 = vector.broadcast %14 : vector<1x64xf32> to vector<2x64xf32>
    %17 = arith.mulf %15, %16 : vector<2x64xf32>
    %18 = arith.addf %12, %17 : vector<2x64xf32>
    %cst_10 = arith.constant 0.000000e+00 : f32
    %19 = vector.broadcast %cst_10 : f32 to vector<2x64xf32>
    %20 = arith.maximumf %18, %19 : vector<2x64xf32>
    %c0_11 = arith.constant 0 : index
    %c0_12 = arith.constant 0 : index
    %21 = vector.load %arg6[%c0_11, %c0_12] : memref<64x64xf32, #tpu.memory_space<vmem>>, vector<64x64xf32>
    %cst_13 = arith.constant dense<0.000000e+00> : vector<2x64xf32>
    %22 = tpu.matmul %20, %21, %cst_13 {dimension_numbers = #tpu.dot_dimension_numbers<[1], [0], [0], [1], [0, 0, 1, 1], [], []>} : vector<2x64xf32>, vector<64x64xf32>, vector<2x64xf32> -> vector<2x64xf32>
    %c0_14 = arith.constant 0 : index
    %c0_15 = arith.constant 0 : index
    %23 = vector.load %arg7[%c0_14, %c0_15] : memref<1x64xf32, #tpu.memory_space<vmem>>, vector<1x64xf32>
    %24 = vector.broadcast %23 : vector<1x64xf32> to vector<2x64xf32>
    %25 = arith.addf %22, %24 : vector<2x64xf32>
    %cst_16 = arith.constant 0.000000e+00 : f32
    %26 = vector.broadcast %cst_16 : f32 to vector<2x64xf32>
    %27 = arith.maximumf %25, %26 : vector<2x64xf32>
    %c0_17 = arith.constant 0 : index
    %c0_18 = arith.constant 0 : index
    %28 = vector.load %arg8[%c0_17, %c0_18] : memref<64x64xf32, #tpu.memory_space<vmem>>, vector<64x64xf32>
    %cst_19 = arith.constant dense<0.000000e+00> : vector<2x64xf32>
    %29 = tpu.matmul %27, %28, %cst_19 {dimension_numbers = #tpu.dot_dimension_numbers<[1], [0], [0], [1], [0, 0, 1, 1], [], []>} : vector<2x64xf32>, vector<64x64xf32>, vector<2x64xf32> -> vector<2x64xf32>
    %c0_20 = arith.constant 0 : index
    %c0_21 = arith.constant 0 : index
    %30 = vector.load %arg9[%c0_20, %c0_21] : memref<1x64xf32, #tpu.memory_space<vmem>>, vector<1x64xf32>
    %31 = vector.broadcast %30 : vector<1x64xf32> to vector<2x64xf32>
    %32 = arith.addf %29, %31 : vector<2x64xf32>
    %cst_22 = arith.constant 0.000000e+00 : f32
    %33 = vector.broadcast %cst_22 : f32 to vector<2x64xf32>
    %34 = arith.maximumf %32, %33 : vector<2x64xf32>
    %c0_23 = arith.constant 0 : index
    %c0_24 = arith.constant 0 : index
    %35 = vector.load %arg10[%c0_23, %c0_24] : memref<64x2xf32, #tpu.memory_space<vmem>>, vector<64x2xf32>
    %cst_25 = arith.constant dense<0.000000e+00> : vector<2x2xf32>
    %36 = tpu.matmul %34, %35, %cst_25 {dimension_numbers = #tpu.dot_dimension_numbers<[1], [0], [0], [1], [0, 0, 1, 1], [], []>} : vector<2x64xf32>, vector<64x2xf32>, vector<2x2xf32> -> vector<2x2xf32>
    %c0_26 = arith.constant 0 : index
    %c0_27 = arith.constant 0 : index
    %37 = vector.load %arg11[%c0_26, %c0_27] : memref<1x2xf32, #tpu.memory_space<vmem>>, vector<1x2xf32>
    %38 = vector.broadcast %37 : vector<1x2xf32> to vector<2x2xf32>
    %39 = arith.addf %36, %38 : vector<2x2xf32>
    %c0_28 = arith.constant 0 : index
    %c0_29 = arith.constant 0 : index
    %40 = vector.load %arg12[%c0_28, %c0_29] : memref<2x2xf32, #tpu.memory_space<vmem>>, vector<2x2xf32>
    tpu.vector_store %arg12[%c0_28, %c0_29], %39 {strides = array<i32>} : memref<2x2xf32, #tpu.memory_space<vmem>>, vector<2x2xf32>,
    return
  }
  func.func @transform_0(%arg0: i32) -> (i32, i32) {
    %c0_i32 = arith.constant 0 : i32
    %c0_i32_0 = arith.constant 0 : i32
    return %arg0, %c0_i32 : i32, i32
  }
  func.func @transform_1(%arg0: i32) -> (i32, i32) {
    %c0_i32 = arith.constant 0 : i32
    %c0_i32_0 = arith.constant 0 : i32
    return %arg0, %c0_i32 : i32, i32
  }
  func.func @transform_2(%arg0: i32) -> (i32, i32) {
    %c0_i32 = arith.constant 0 : i32
    %c0_i32_0 = arith.constant 0 : i32
    %c0_i32_1 = arith.constant 0 : i32
    return %c0_i32, %c0_i32_0 : i32, i32
  }
  func.func @transform_3(%arg0: i32) -> (i32, i32) {
    %c0_i32 = arith.constant 0 : i32
    %c0_i32_0 = arith.constant 0 : i32
    %c0_i32_1 = arith.constant 0 : i32
    return %c0_i32, %c0_i32_0 : i32, i32
  }
  func.func @transform_4(%arg0: i32) -> (i32, i32) {
    %c0_i32 = arith.constant 0 : i32
    %c0_i32_0 = arith.constant 0 : i32
    %c0_i32_1 = arith.constant 0 : i32
    return %c0_i32, %c0_i32_0 : i32, i32
  }
  func.func @transform_5(%arg0: i32) -> (i32, i32) {
    %c0_i32 = arith.constant 0 : i32
    %c0_i32_0 = arith.constant 0 : i32
    %c0_i32_1 = arith.constant 0 : i32
    return %c0_i32, %c0_i32_0 : i32, i32
  }
  func.func @transform_6(%arg0: i32) -> (i32, i32) {
    %c0_i32 = arith.constant 0 : i32
    %c0_i32_0 = arith.constant 0 : i32
    %c0_i32_1 = arith.constant 0 : i32
    return %c0_i32, %c0_i32_0 : i32, i32
  }
  func.func @transform_7(%arg0: i32) -> (i32, i32) {
    %c0_i32 = arith.constant 0 : i32
    %c0_i32_0 = arith.constant 0 : i32
    %c0_i32_1 = arith.constant 0 : i32
    return %c0_i32, %c0_i32_0 : i32, i32
  }
  func.func @transform_8(%arg0: i32) -> (i32, i32) {
    %c0_i32 = arith.constant 0 : i32
    %c0_i32_0 = arith.constant 0 : i32
    %c0_i32_1 = arith.constant 0 : i32
    return %c0_i32, %c0_i32_0 : i32, i32
  }
  func.func @transform_9(%arg0: i32) -> (i32, i32) {
    %c0_i32 = arith.constant 0 : i32
    %c0_i32_0 = arith.constant 0 : i32
    %c0_i32_1 = arith.constant 0 : i32
    return %c0_i32, %c0_i32_0 : i32, i32
  }
  func.func @transform_10(%arg0: i32) -> (i32, i32) {
    %c0_i32 = arith.constant 0 : i32
    %c0_i32_0 = arith.constant 0 : i32
    %c0_i32_1 = arith.constant 0 : i32
    return %c0_i32, %c0_i32_0 : i32, i32
  }
  func.func @transform_11(%arg0: i32) -> (i32, i32) {
    %c0_i32 = arith.constant 0 : i32
    %c0_i32_0 = arith.constant 0 : i32
    return %arg0, %c0_i32 : i32, i32
  }
}

</mosaic_0001>

<bundles_post_ra>
// kernel: tpu_custom_call.1
= control target key start
LH: loop header
LB: loop body
LE: loop exit
PB: predicated region body
PF: predicated region fallthrough
CT: control target
= control target key end

     0   :  { %16 = vsyncpa [#allocation3], 0  ;;  %s839_s0 = inlined_call_operand.vmem [shape: f32[2,32], index: 0, kind: input, shape index: {}]   ;;  %s840_s1 = inlined_call_operand.vmem [shape: f32[2,2], index: 1, kind: input, shape index: {}]   ;;  %s841_s2 = inlined_call_operand.hbm [shape: f32[32,64], index: 2, kind: input, shape index: {}]   ;;  %s842_s3 = inlined_call_operand.vmem [shape: f32[2,64], index: 3, kind: input, shape index: {}]   ;;  %s843_s4 = inlined_call_operand.vmem [shape: f32[1,64], index: 4, kind: input, shape index: {}]   ;;  %s844_s5 = inlined_call_operand.vmem [shape: f32[64,64], index: 5, kind: input, shape index: {}]   ;;  %s845_s6 = inlined_call_operand.vmem [shape: f32[1,64], index: 6, kind: input, shape index: {}]   ;;  %s846_s7 = inlined_call_operand.hbm [shape: f32[64,64], index: 7, kind: input, shape index: {}]   ;;  %s847_s8 = inlined_call_operand.vmem [shape: f32[1,64], index: 8, kind: input, shape index: {}]   ;;  %s848_s9 = inlined_call_operand.vmem [shape: f32[64,2], index: 9, kind: input, shape index: {}]   ;;  %s849_s10 = inlined_call_operand.vmem [shape: f32[1,2], index: 10, kind: input, shape index: {}]   ;;  %s850_s11 = inlined_call_operand.hbm [shape: f32[2,2], index: 11, kind: output, shape index: {}]  }
   0x1   :  { %17 = vsyncpa [#allocation6], 0 }
   0x2   :  { %18 = vsyncpa [#allocation4], 0  ;;  %s650_s17 = smov [#allocation2]  }
   0x3   :  { %s28_s18 = sshll.u32 %s650_s17, 4  ;;  %s29_s18 = int_to_ptr.vmem [resolvable:$true] %s28_s18 }
   0x4   :  { %s592_s19 = scalar_lea.vmem %s29_s18, 512  ;;  %p597_p1 = scmp.lt.s32.totalorder %s29_s18, %s29_s18 }
   0x5   :  { %p593_p0 = scmp.ne.s32.totalorder %s29_s18, %s592_s19  ;;  %p598_p2 = scmp.lt.s32.totalorder %s592_s19, %s592_s19 }
   0x7   :  { %p599_p3 = por %p598_p2, %p597_p1 }
   0x9   :  { %p600_p4 = pnand %p599_p3, %p593_p0 }
   0xb   :  { %603 = shalt.err (!%p600_p4)
}
   0xc   :  { %s651_s20 = smov 128   ;;  %s652_s21 = smov 8  }
   0xd   :  { %34 = dma.hbm_to_vmem [thread:$0]  %s841_s2, 512, %s29_s18, [#allocation3], %s651_s20, %s651_s20, %s652_s21  }
   0xe   :  { %s653_s24 = smov [#allocation5]  }
   0xf   :  { %s48_s25 = sshll.u32 %s653_s24, 4  ;;  %s49_s25 = int_to_ptr.vmem [resolvable:$true] %s48_s25 }
  0x10   :  { %s612_s26 = scalar_lea.vmem %s49_s25, 1024  ;;  %p617_p6 = scmp.lt.s32.totalorder %s49_s25, %s49_s25 }
  0x11   :  { %p613_p5 = scmp.ne.s32.totalorder %s49_s25, %s612_s26  ;;  %p618_p7 = scmp.lt.s32.totalorder %s612_s26, %s612_s26 }
  0x13   :  { %p619_p8 = por %p618_p7, %p617_p6 }
  0x15   :  { %p620_p9 = pnand %p619_p8, %p613_p5 }
  0x17   :  { %623 = shalt.err (!%p620_p9)
}
  0x18   :  { %54 = dma.hbm_to_vmem [thread:$0]  %s846_s7, 1024, %s49_s25, [#allocation6], %s651_s20, %s651_s20, %s652_s21  }
  0x19   :  { %644 = dma.done.wait [#allocation3], 512  }
  0x1a   :  { %645 = vsyncadd [#allocation3], 4294966784 }
  0x1b   :  { %646 = dma.done.wait [#allocation6], 1024  }
  0x1c   :  { %647 = vsyncadd [#allocation6], 4294966272  ;;  %v654_v0 = vmov 0.0   ;;  %vm655_vm0 = vmmov 0   ;;  %v656_v1 = vmov 0   ;;  %v71_v2 = vld [vmem:[#allocation2 + $0x18] sm:$0xff] }
  0x1d   :  { %505 = vmatprep.subr.mxu0 %v654_v0  ;;  %513 = vmatprep.mubr.msk.f32.mxu0 %vm655_vm0, %v654_v0  ;;  %v70_v3 = vld [vmem:[#allocation2 + $0x10] sm:$0xff]  ;;  %v153_v4 = vld [vmem:[%s840_s1] sm:$0x3]  ;;  %v69_v5 = vld [vmem:[#allocation2 + $0x8] sm:$0xff]  ;;  %vm79_vm1 = vcmask 261120   ;;  %v657_v10 = vmov 1  }
  0x1e   :  { %582 = vset.pattern.permute.xlu0 %v656_v1  ;;  %516 = vmatprep.subr.mxu1 %v654_v0  ;;  %v185_v6 = vld [vmem:[%s844_s5 + $0x38] sm:$0xff]  ;;  %v184_v7 = vld [vmem:[%s844_s5 + $0x30] sm:$0xff]  ;;  %v68_v8 = vld [vmem:[#allocation2] sm:$0xff]  ;;  %vm193_vm2 = vcmask 523264   ;;  %s658_s26 = smov [#allocation7]   ;;  %vm445_vm3 = vcmask 9216  }
  0x1f   :  { %532 = vmatprep.mubr.msk.f32.mxu1 %vm655_vm0, %v654_v0  ;;  %506 = vmatpush3.msra.mxu0 %v71_v2  ;;  %v67_v9 = vld [vmem:[%s839_s0] sm:$0x3]  ;;  %v183_v11 = vld [vmem:[%s844_s5 + $0x28] sm:$0xff]  ;;  %v181_v13 = vld [vmem:[%s844_s5 + $0x18] sm:$0xff]  ;;  %s453_s27 = sshll.u32 %s658_s26, 4  ;;  %s454_s27 = int_to_ptr.vmem [resolvable:$true] %s453_s27 }
  0x20   :  { %507 = vmatprep.subr.mxu0 %v654_v0  ;;  %157 = vperm.xlu0 %582, %v153_v4   ;;  %v182_v12 = vld [vmem:[%s844_s5 + $0x20] sm:$0xff]  ;;  %v180_v14 = vld [vmem:[%s844_s5 + $0x10] sm:$0xff]  ;;  %v179_v15 = vld [vmem:[%s844_s5 + $0x8] sm:$0xff]  ;;  %p629_p11 = scmp.lt.s32.totalorder %s454_s27, %s454_s27 }
  0x21   :  { %508 = vmatpush3.msra.mxu0 %v70_v3  ;;  %517 = vmatpush3.msra.mxu1 %v185_v6  ;;  %v178_v16 = vld [vmem:[%s844_s5] sm:$0xff]  ;;  %v275_v17 = vld [vmem:[#allocation5 + $0x38] sm:$0xff]  ;;  %v274_v18 = vld [vmem:[#allocation5 + $0x30] sm:$0xff] }
  0x22   :  { %509 = vmatprep.subr.mxu0 %v654_v0  ;;  %518 = vmatprep.subr.mxu1 %v654_v0  ;;  %v273_v19 = vld [vmem:[#allocation5 + $0x28] sm:$0xff]  ;;  %v272_v20 = vld [vmem:[#allocation5 + $0x20] sm:$0xff]  ;;  %v271_v21 = vld [vmem:[#allocation5 + $0x18] sm:$0xff] }
  0x23   :  { %510 = vmatpush3.msra.mxu0 %v69_v5  ;;  %519 = vmatpush3.msra.mxu1 %v184_v7  ;;  %v465_v23 = vld [vmem:[%s842_s3] ss:$0 sm:$0xff]  ;;  %v466_v25 = vld [vmem:[%s842_s3 + $0x1] ss:$0 sm:$0xff]  ;;  %v270_v35 = vld [vmem:[#allocation5 + $0x10] sm:$0xff] }
  0x24   :  { %511 = vmatprep.subr.mxu0 %v654_v0  ;;  %583 = vset.pattern.permute.xlu0 %v657_v10  ;;  %v463_v24 = vld [vmem:[%s843_s4] ss:$0 sm:$0xff]  ;;  %v269_v36 = vld [vmem:[#allocation5 + $0x8] sm:$0xff]  ;;  %v364_v38 = vld [vmem:[%s848_s9 + $0x38] sm:$0xff] }
  0x25   :  { %512 = vmatpush3.msra.mxu0 %v68_v8  ;;  %168 = vperm.xlu0 %583, %v153_v4   ;;  %v268_v37 = vld [vmem:[#allocation5] sm:$0xff]  ;;  %v363_v39 = vld [vmem:[%s848_s9 + $0x30] sm:$0xff]  ;;  %v362_v40 = vld [vmem:[%s848_s9 + $0x28] sm:$0xff] }
  0x26   :  { %514 = vmatmul.mubr.msk.f32.vlgmr.msra.gmra.mxu0 %vm79_vm1, %v67_v9  ;;  %520 = vmatprep.subr.mxu1 %v654_v0  ;;  %v361_v41 = vld [vmem:[%s848_s9 + $0x20] sm:$0xff]  ;;  %v360_v42 = vld [vmem:[%s848_s9 + $0x18] sm:$0xff]  ;;  %v359_v48 = vld [vmem:[%s848_s9 + $0x10] sm:$0xff] }
  0x27   :  { %521 = vmatpush3.msra.mxu1 %v183_v11  ;;  %535 = vmatprep.subr.mxu0 %v654_v0  ;;  %v467_v43 = vld [vmem:[%s845_s6] ss:$0 sm:$0xff]  ;;  %v358_v49 = vld [vmem:[%s848_s9 + $0x8] sm:$0xff] }
  0x28   :  { %522 = vmatprep.subr.mxu1 %v654_v0  ;;  %551 = vmatprep.mubr.msk.f32.mxu0 %vm655_vm0, %v654_v0  ;;  %v357_v50 = vld [vmem:[%s848_s9] sm:$0xff]  ;;  %s624_s9 = scalar_lea.vmem %s454_s27, 32 }
  0x29   :  { %523 = vmatpush3.msra.mxu1 %v182_v12  ;;  %536 = vmatpush3.msra.mxu0 %v275_v17  ;;  %v469_v51 = vld [vmem:[%s847_s8] ss:$0 sm:$0xff]  ;;  %p625_p10 = scmp.ne.s32.totalorder %s454_s27, %s624_s9  ;;  %p630_p12 = scmp.lt.s32.totalorder %s624_s9, %s624_s9 }
  0x2a   :  { %524 = vmatprep.subr.mxu1 %v654_v0  ;;  %537 = vmatprep.subr.mxu0 %v654_v0  ;;  %v471_v56 = vld [vmem:[%s849_s10] ss:$0 sm:$0xff] }
  0x2b   :  { %525 = vmatpush3.msra.mxu1 %v181_v13  ;;  %538 = vmatpush3.msra.mxu0 %v274_v18  ;;  %p631_p13 = por %p630_p12, %p629_p11 }
  0x2c   :  { %526 = vmatprep.subr.mxu1 %v654_v0  ;;  %539 = vmatprep.subr.mxu0 %v654_v0 }
  0x2d   :  { %527 = vmatpush3.msra.mxu1 %v180_v14  ;;  %540 = vmatpush3.msra.mxu0 %v273_v19  ;;  %p632_p0 = pnand %p631_p13, %p625_p10 }
  0x2e   :  { %528 = vmatprep.subr.mxu1 %v654_v0  ;;  %541 = vmatprep.subr.mxu0 %v654_v0 }
  0x2f   :  { %529 = vmatpush3.msra.mxu1 %v179_v15  ;;  %542 = vmatpush3.msra.mxu0 %v272_v20 }
  0x30   :  { %530 = vmatprep.subr.mxu1 %v654_v0  ;;  %543 = vmatprep.subr.mxu0 %v654_v0 }
  0x31   :  { %531 = vmatpush3.msra.mxu1 %v178_v16  ;;  %544 = vmatpush3.msra.mxu0 %v271_v21 }
  0x32   :  { %554 = vmatprep.subr.mxu1 %v654_v0  ;;  %545 = vmatprep.subr.mxu0 %v654_v0 }
  0x33   :  { %546 = vmatpush3.msra.mxu0 %v270_v35 }
  0x34   :  { %547 = vmatprep.subr.mxu0 %v654_v0 }
  0x35   :  { %548 = vmatpush3.msra.mxu0 %v269_v36 }
  0x36   :  { %549 = vmatprep.subr.mxu0 %v654_v0 }
  0x37   :  { %550 = vmatpush3.msra.mxu0 %v268_v37 }
  0x9b   :  { %v158_v22 = vpop.permute.xlu0 %157 }
  0x9c   :  { %v164_v28 = vmul.f32 %v465_v23, %v158_v22 }
  0xa0   :  { %v169_v26 = vpop.permute.xlu0 %168 }
  0xa1   :  { %v175_v30 = vmul.f32 %v466_v25, %v169_v26 }
  0xe6   :  { %v149_v27 = vpop.f32.mrf.mxu0 }
  0xe7   :  { %v150_v29 = vadd.f32 %v463_v24, %v149_v27 }
  0xe8   :  { %v515_v31 = vpop.f32.mrf.mxu0 }
  0xe9   :  { %v165_v32 = vadd.f32 %v164_v28, %v150_v29 }
  0xeb   :  { %v176_v33 = vadd.f32 %v175_v30, %v165_v32 }
  0xed   :  { %v177_v34 = vmax.f32 %v176_v33, 0.0 }
  0xef   :  { %533 = vmatmul.mubr.msk.f32.vlgmr.msra.gmra.mxu1 %vm193_vm2, %v177_v34 }
  0xf0   :  { %570 = vmatprep.mubr.msk.f32.mxu1 %vm655_vm0, %v654_v0  ;;  %555 = vmatpush3.msra.mxu1 %v364_v38 }
  0xf1   :  { %556 = vmatprep.subr.mxu1 %v654_v0 }
  0xf2   :  { %557 = vmatpush3.msra.mxu1 %v363_v39 }
  0xf3   :  { %558 = vmatprep.subr.mxu1 %v654_v0 }
  0xf4   :  { %559 = vmatpush3.msra.mxu1 %v362_v40 }
  0xf5   :  { %560 = vmatprep.subr.mxu1 %v654_v0 }
  0xf6   :  { %561 = vmatpush3.msra.mxu1 %v361_v41 }
  0xf7   :  { %562 = vmatprep.subr.mxu1 %v654_v0 }
  0xf8   :  { %563 = vmatpush3.msra.mxu1 %v360_v42 }
  0xf9   :  { %564 = vmatprep.subr.mxu1 %v654_v0 }
  0xfa   :  { %565 = vmatpush3.msra.mxu1 %v359_v48 }
  0xfb   :  { %566 = vmatprep.subr.mxu1 %v654_v0 }
  0xfc   :  { %567 = vmatpush3.msra.mxu1 %v358_v49 }
  0xfd   :  { %568 = vmatprep.subr.mxu1 %v654_v0 }
  0xfe   :  { %569 = vmatpush3.msra.mxu1 %v357_v50 }
 0x1af   :  { %v263_v44 = vpop.f32.mrf.mxu1 }
 0x1b0   :  { %v264_v45 = vadd.f32 %v467_v43, %v263_v44 }
 0x1b1   :  { %v534_v46 = vpop.f32.mrf.mxu1 }
 0x1b2   :  { %v267_v47 = vmax.f32 %v264_v45, 0.0 }
 0x1b4   :  { %552 = vmatmul.mubr.msk.f32.vlgmr.msra.gmra.mxu0 %vm193_vm2, %v267_v47 }
 0x274   :  { %v352_v52 = vpop.f32.mrf.mxu0 }
 0x275   :  { %v353_v53 = vadd.f32 %v469_v51, %v352_v52 }
 0x276   :  { %v553_v54 = vpop.f32.mrf.mxu0 }
 0x277   :  { %v356_v55 = vmax.f32 %v353_v53, 0.0 }
 0x279   :  { %571 = vmatmul.mubr.msk.f32.vlgmr.msra.gmra.mxu1 %vm193_vm2, %v356_v55 }
 0x339   :  { %v441_v57 = vpop.f32.mrf.mxu1 }
 0x33a   :  { %v442_v58 = vadd.f32 %v471_v56, %v441_v57 }
 0x33b   :  { %v572_v59 = vpop.f32.mrf.mxu1 }
 0x33c   :  { %446 = vst.msk [vmem:[#allocation7] sm:$0x3] %vm445_vm3, %v442_v58 }
 0x33d   :  { %635 = shalt.err (!%p632_p0)
}
 0x33e   :  { %456 = dma.vmem_to_hbm [thread:$0]  %s454_s27, 32, %s850_s11, [#allocation4]  }
 0x33f   :  { %648 = dma.done.wait [#allocation4], 32  }
 0x340   :  { %649 = vsyncadd [#allocation4], 4294967264 }
 0x341   :  { %460 = vsyncpa [#allocation3], 1 }
 0x342   :  { %461 = vsyncpa [#allocation6], 1 }
 0x343   :  { %462 = vsyncpa [#allocation4], 1 }

</bundles_post_ra>
